<compile_context>
chip_gen: v6e
topology: v6e:2x2x1
jax: 0.10.0
libtpu: 0.0.40
codegen_flags: <defaults>
</compile_context>

<pallas_src>
import jax
import jax.numpy as jnp
from jax.experimental import pallas as pl
from jax.experimental.pallas import tpu as pltpu

LANE = 128  # lane-dense padded feature width (one vreg row)


# ---------------------------------------------------------------------------
# Fused Pallas kernel: whole network, single launch, everything VMEM-resident.
#   x_ref : (Mp, 128)      padded batch of flattened inputs
#   w_ref : (5, 128, 128)  stacked folded weight matrices (conv1, res1, res2,
#                          lin1, lin2), each zero-padded to 128x128
#   b_ref : (8, 128)       rows 0..4 hold the corresponding bias vectors
#   o_ref : (Mp, 128)      padded output (first 10 lanes valid)
# ---------------------------------------------------------------------------
def _fused_net_kernel(x_ref, w_ref, b_ref, o_ref):
    x = x_ref[...]                                            # (Mp, 128)
    b = b_ref[...]                                            # (8, 128), one vreg

    def fc(h, i):  # i is a Python int -> static slices, clean MXU matmul
        acc = jnp.dot(h, w_ref[i], preferred_element_type=jnp.float32)
        return acc + b[i:i + 1, :]

    # x = relu(conv1(x))                 (conv folded into dense matrix)
    h1 = jnp.maximum(fc(x, 0), 0.0)
    # resnet[0]: conv + ReLU
    h2 = jnp.maximum(fc(h1, 1), 0.0)
    # resnet[2]: conv, then + residual (h1), ReLU
    h3 = jnp.maximum(fc(h2, 2) + h1, 0.0)
    # linear (torch flatten order baked into the lane layout) + ReLU
    h4 = jnp.maximum(fc(h3, 3), 0.0)
    # linear2
    o_ref[...] = fc(h4, 4).astype(o_ref.dtype)


# ---------------------------------------------------------------------------
# Init-time weight preprocessing: conv -> dense matrix, pad & stack.
# ---------------------------------------------------------------------------
def _conv_to_matrix(w_hwio, bias, cin, h, w, stride, padding):
    """Return (T, b_flat): y_flat = x_flat @ T + b_flat, in (C,H,W) flatten order."""
    din = cin * h * w
    eye = jnp.eye(din, dtype=jnp.float32).reshape(din, cin, h, w)   # NCHW basis
    out = jax.lax.conv_general_dilated(
        eye, w_hwio.astype(jnp.float32), (stride, stride),
        [(padding, padding), (padding, padding)],
        dimension_numbers=("NCHW", "HWIO", "NCHW"))                  # (din, cout, Ho, Wo)
    cout, ho, wo = out.shape[1], out.shape[2], out.shape[3]
    t = out.reshape(din, cout * ho * wo)                             # C-major output order
    b_flat = jnp.repeat(bias.astype(jnp.float32), ho * wo)           # bias per out index
    return t, b_flat


def _pad_mat(t):
    out = jnp.zeros((LANE, LANE), jnp.float32)
    return out.at[:t.shape[0], :t.shape[1]].set(t.astype(jnp.float32))


def prepare_fused_params(params):
    t1, b1 = _conv_to_matrix(params["conv1_w"], params["conv1_b"], 1, 8, 8, 2, 1)
    t2, b2 = _conv_to_matrix(params["res1_w"], params["res1_b"], 3, 4, 4, 1, 1)
    t3, b3 = _conv_to_matrix(params["res2_w"], params["res2_b"], 3, 4, 4, 1, 1)
    mats = [t1, t2, t3, params["lin1_w"], params["lin1_b"] * 0 + params["lin1_w"] * 0][:3]
    # Stack weights: (5, 128, 128)
    w_stack = jnp.stack([
        _pad_mat(t1), _pad_mat(t2), _pad_mat(t3),
        _pad_mat(params["lin1_w"]), _pad_mat(params["lin2_w"]),
    ])
    # Stack biases into one vreg: (8, 128), rows 0..4 used
    b_stack = jnp.zeros((8, LANE), jnp.float32)
    for i, bv in enumerate([b1, b2, b3, params["lin1_b"], params["lin2_b"]]):
        b_stack = b_stack.at[i, :bv.shape[0]].set(bv.astype(jnp.float32))
    return {"W": w_stack, "B": b_stack}


# ---------------------------------------------------------------------------
# Parameters (deterministic synthetic init, shapes from regular_net.__init__)
# ---------------------------------------------------------------------------
def init_params(key):
    ks = jax.random.split(key, 10)
    scale = 0.1
    return {
        # conv1: Conv2d(1, 3, 3, stride=2, padding=1)   (HWIO)
        "conv1_w": scale * jax.random.normal(ks[0], (3, 3, 1, 3), jnp.float32),
        "conv1_b": scale * jax.random.normal(ks[1], (3,), jnp.float32),
        # resnet[0]: Conv2d(3, 3, 3, padding=1)
        "res1_w": scale * jax.random.normal(ks[2], (3, 3, 3, 3), jnp.float32),
        "res1_b": scale * jax.random.normal(ks[3], (3,), jnp.float32),
        # resnet[2]: Conv2d(3, 3, 3, padding=1)
        "res2_w": scale * jax.random.normal(ks[4], (3, 3, 3, 3), jnp.float32),
        "res2_b": scale * jax.random.normal(ks[5], (3,), jnp.float32),
        # linear: Linear(4*4*3=48, 40), stored (in, out) so y = x @ W + b
        "lin1_w": scale * jax.random.normal(ks[6], (48, 40), jnp.float32),
        "lin1_b": scale * jax.random.normal(ks[7], (40,), jnp.float32),
        # linear2: Linear(40, 10)
        "lin2_w": scale * jax.random.normal(ks[8], (40, 10), jnp.float32),
        "lin2_b": scale * jax.random.normal(ks[9], (10,), jnp.float32),
    }


# ---------------------------------------------------------------------------
# Forward pass: one pallas_call; only a reshape+pad before, a slice after.
# ---------------------------------------------------------------------------
def regular_net_forward(x_nchw, fused):
    n = x_nchw.shape[0]
    mp = max(8, ((n + 7) // 8) * 8)
    xf = x_nchw.reshape(n, -1).astype(jnp.float32)          # (N, 64), torch (C,H,W) order
    xp = jnp.zeros((mp, LANE), jnp.float32).at[:n, :xf.shape[1]].set(xf)

    vmem = pl.BlockSpec(memory_space=pltpu.MemorySpace.VMEM)
    out = pl.pallas_call(
        _fused_net_kernel,
        out_shape=jax.ShapeDtypeStruct((mp, LANE), jnp.float32),
        in_specs=[vmem, vmem, vmem],
        out_specs=vmem,
    )(xp, fused["W"], fused["B"])
    return out[:n, :10]


# ---------------------------------------------------------------------------
# Pure-JAX reference (mirrors regular_net.forward exactly) for verification.
# ---------------------------------------------------------------------------
def reference_forward(x_nchw, params):
    def conv(x, w_hwio, b, stride, padding):
        y = jax.lax.conv_general_dilated(
            x, w_hwio, (stride, stride), [(padding, padding)] * 2,
            dimension_numbers=("NCHW", "HWIO", "NCHW"))
        return y + b.reshape(1, -1, 1, 1)

    h = jax.nn.relu(conv(x_nchw, params["conv1_w"], params["conv1_b"], 2, 1))
    r = jax.nn.relu(conv(h, params["res1_w"], params["res1_b"], 1, 1))
    r = conv(r, params["res2_w"], params["res2_b"], 1, 1)
    h = jax.nn.relu(r + h)
    hf = h.reshape(h.shape[0], -1)                           # NCHW flatten = torch order
    h = jax.nn.relu(hf @ params["lin1_w"] + params["lin1_b"])
    return h @ params["lin2_w"] + params["lin2_b"]


if __name__ == "__main__":
    key = jax.random.PRNGKey(0)
    kx, kp = jax.random.split(key)
    # Input implied by Linear(4*4*3, ...) after the stride-2 conv => (N, 1, 8, 8).
    x = jax.random.normal(kx, (2, 1, 8, 8), jnp.float32)     # NCHW, like PyTorch
    params = init_params(kp)
    fused = prepare_fused_params(params)

    fwd = jax.jit(regular_net_forward)
    y = jax.block_until_ready(fwd(x, fused))
    y_ref = jax.block_until_ready(reference_forward(x, params))

    assert y.shape == (2, 10), y.shape
    assert bool(jnp.all(jnp.isfinite(y)))
    assert bool(jnp.allclose(y, y_ref, rtol=1e-3, atol=1e-3)), (y, y_ref)
    print("KERNEL_OK")
</pallas_src>

<mosaic_0001>
module attributes {stable_mosaic.version = 11 : i64} {
  func.func @_fused_net_kernel(%arg0: memref<8x128xf32, #tpu.memory_space<vmem>>, %arg1: memref<5x128x128xf32, #tpu.memory_space<vmem>>, %arg2: memref<8x128xf32, #tpu.memory_space<vmem>>, %arg3: memref<8x128xf32, #tpu.memory_space<vmem>>) attributes {dimension_semantics = [], scalar_prefetch = 0 : i64, scratch_operands = 0 : i64, tpu.core_type = #tpu.core_type<tc>} {
    %c0 = arith.constant 0 : index
    %c0_0 = arith.constant 0 : index
    %0 = vector.load %arg0[%c0, %c0_0] : memref<8x128xf32, #tpu.memory_space<vmem>>, vector<8x128xf32>
    %c0_1 = arith.constant 0 : index
    %c0_2 = arith.constant 0 : index
    %1 = vector.load %arg2[%c0_1, %c0_2] : memref<8x128xf32, #tpu.memory_space<vmem>>, vector<8x128xf32>
    %c0_3 = arith.constant 0 : index
    %c0_4 = arith.constant 0 : index
    %c0_5 = arith.constant 0 : index
    %2 = vector.load %arg1[%c0_3, %c0_4, %c0_5] : memref<5x128x128xf32, #tpu.memory_space<vmem>>, vector<1x128x128xf32>
    %3 = vector.shape_cast %2 : vector<1x128x128xf32> to vector<128x128xf32>
    %cst = arith.constant dense<0.000000e+00> : vector<8x128xf32>
    %4 = tpu.matmul %0, %3, %cst {dimension_numbers = #tpu.dot_dimension_numbers<[1], [0], [0], [1], [0, 0, 1, 1], [], []>} : vector<8x128xf32>, vector<128x128xf32>, vector<8x128xf32> -> vector<8x128xf32>
    %5 = vector.extract_strided_slice %1 {offsets = [0, 0], sizes = [1, 128], strides = [1, 1]} : vector<8x128xf32> to vector<1x128xf32>
    %6 = vector.broadcast %5 : vector<1x128xf32> to vector<8x128xf32>
    %7 = arith.addf %4, %6 : vector<8x128xf32>
    %cst_6 = arith.constant 0.000000e+00 : f32
    %8 = vector.broadcast %cst_6 : f32 to vector<8x128xf32>
    %9 = arith.maximumf %7, %8 : vector<8x128xf32>
    %c1 = arith.constant 1 : index
    %c0_7 = arith.constant 0 : index
    %c0_8 = arith.constant 0 : index
    %10 = vector.load %arg1[%c1, %c0_7, %c0_8] : memref<5x128x128xf32, #tpu.memory_space<vmem>>, vector<1x128x128xf32>
    %11 = vector.shape_cast %10 : vector<1x128x128xf32> to vector<128x128xf32>
    %cst_9 = arith.constant dense<0.000000e+00> : vector<8x128xf32>
    %12 = tpu.matmul %9, %11, %cst_9 {dimension_numbers = #tpu.dot_dimension_numbers<[1], [0], [0], [1], [0, 0, 1, 1], [], []>} : vector<8x128xf32>, vector<128x128xf32>, vector<8x128xf32> -> vector<8x128xf32>
    %13 = vector.extract_strided_slice %1 {offsets = [1, 0], sizes = [1, 128], strides = [1, 1]} : vector<8x128xf32> to vector<1x128xf32>
    %14 = vector.broadcast %13 : vector<1x128xf32> to vector<8x128xf32>
    %15 = arith.addf %12, %14 : vector<8x128xf32>
    %cst_10 = arith.constant 0.000000e+00 : f32
    %16 = vector.broadcast %cst_10 : f32 to vector<8x128xf32>
    %17 = arith.maximumf %15, %16 : vector<8x128xf32>
    %c2 = arith.constant 2 : index
    %c0_11 = arith.constant 0 : index
    %c0_12 = arith.constant 0 : index
    %18 = vector.load %arg1[%c2, %c0_11, %c0_12] : memref<5x128x128xf32, #tpu.memory_space<vmem>>, vector<1x128x128xf32>
    %19 = vector.shape_cast %18 : vector<1x128x128xf32> to vector<128x128xf32>
    %cst_13 = arith.constant dense<0.000000e+00> : vector<8x128xf32>
    %20 = tpu.matmul %17, %19, %cst_13 {dimension_numbers = #tpu.dot_dimension_numbers<[1], [0], [0], [1], [0, 0, 1, 1], [], []>} : vector<8x128xf32>, vector<128x128xf32>, vector<8x128xf32> -> vector<8x128xf32>
    %21 = vector.extract_strided_slice %1 {offsets = [2, 0], sizes = [1, 128], strides = [1, 1]} : vector<8x128xf32> to vector<1x128xf32>
    %22 = vector.broadcast %21 : vector<1x128xf32> to vector<8x128xf32>
    %23 = arith.addf %20, %22 : vector<8x128xf32>
    %24 = arith.addf %23, %9 : vector<8x128xf32>
    %cst_14 = arith.constant 0.000000e+00 : f32
    %25 = vector.broadcast %cst_14 : f32 to vector<8x128xf32>
    %26 = arith.maximumf %24, %25 : vector<8x128xf32>
    %c3 = arith.constant 3 : index
    %c0_15 = arith.constant 0 : index
    %c0_16 = arith.constant 0 : index
    %27 = vector.load %arg1[%c3, %c0_15, %c0_16] : memref<5x128x128xf32, #tpu.memory_space<vmem>>, vector<1x128x128xf32>
    %28 = vector.shape_cast %27 : vector<1x128x128xf32> to vector<128x128xf32>
    %cst_17 = arith.constant dense<0.000000e+00> : vector<8x128xf32>
    %29 = tpu.matmul %26, %28, %cst_17 {dimension_numbers = #tpu.dot_dimension_numbers<[1], [0], [0], [1], [0, 0, 1, 1], [], []>} : vector<8x128xf32>, vector<128x128xf32>, vector<8x128xf32> -> vector<8x128xf32>
    %30 = vector.extract_strided_slice %1 {offsets = [3, 0], sizes = [1, 128], strides = [1, 1]} : vector<8x128xf32> to vector<1x128xf32>
    %31 = vector.broadcast %30 : vector<1x128xf32> to vector<8x128xf32>
    %32 = arith.addf %29, %31 : vector<8x128xf32>
    %cst_18 = arith.constant 0.000000e+00 : f32
    %33 = vector.broadcast %cst_18 : f32 to vector<8x128xf32>
    %34 = arith.maximumf %32, %33 : vector<8x128xf32>
    %c4 = arith.constant 4 : index
    %c0_19 = arith.constant 0 : index
    %c0_20 = arith.constant 0 : index
    %35 = vector.load %arg1[%c4, %c0_19, %c0_20] : memref<5x128x128xf32, #tpu.memory_space<vmem>>, vector<1x128x128xf32>
    %36 = vector.shape_cast %35 : vector<1x128x128xf32> to vector<128x128xf32>
    %cst_21 = arith.constant dense<0.000000e+00> : vector<8x128xf32>
    %37 = tpu.matmul %34, %36, %cst_21 {dimension_numbers = #tpu.dot_dimension_numbers<[1], [0], [0], [1], [0, 0, 1, 1], [], []>} : vector<8x128xf32>, vector<128x128xf32>, vector<8x128xf32> -> vector<8x128xf32>
    %38 = vector.extract_strided_slice %1 {offsets = [4, 0], sizes = [1, 128], strides = [1, 1]} : vector<8x128xf32> to vector<1x128xf32>
    %39 = vector.broadcast %38 : vector<1x128xf32> to vector<8x128xf32>
    %40 = arith.addf %37, %39 : vector<8x128xf32>
    %c0_22 = arith.constant 0 : index
    %c0_23 = arith.constant 0 : index
    %41 = vector.load %arg3[%c0_22, %c0_23] : memref<8x128xf32, #tpu.memory_space<vmem>>, vector<8x128xf32>
    tpu.vector_store %arg3[%c0_22, %c0_23], %40 {strides = array<i32>} : memref<8x128xf32, #tpu.memory_space<vmem>>, vector<8x128xf32>,
    return
  }
}

</mosaic_0001>

<bundles_post_ra>
// kernel: regular_net_forward.1
= control target key start
LH: loop header
LB: loop body
LE: loop exit
PB: predicated region body
PF: predicated region fallthrough
CT: control target
= control target key end

     0   :  { %8 = vsyncpa [#allocation3], 0  ;;  %s782_s12 = smov [#allocation2]   ;;  %s930_s0 = inlined_call_operand.vmem [shape: f32[8,128], index: 0, kind: input, shape index: {}]   ;;  %s931_s1 = inlined_call_operand.hbm [shape: f32[5,128,128], index: 1, kind: input, shape index: {}]   ;;  %s932_s2 = inlined_call_operand.vmem [shape: f32[8,128], index: 2, kind: input, shape index: {}]   ;;  %s933_s3 = inlined_call_operand.vmem [shape: f32[8,128], index: 3, kind: output, shape index: {}]  }
   0x1   :  { %s16_s13 = sshll.u32 %s782_s12, 4  ;;  %s17_s13 = int_to_ptr.vmem [resolvable:$true] %s16_s13 }
   0x2   :  { %s768_s14 = scalar_lea.vmem %s17_s13, 10240  ;;  %p773_p1 = scmp.lt.s32.totalorder %s17_s13, %s17_s13 }
   0x3   :  { %p769_p0 = scmp.ne.s32.totalorder %s17_s13, %s768_s14  ;;  %p774_p2 = scmp.lt.s32.totalorder %s768_s14, %s768_s14 }
   0x5   :  { %p775_p3 = por %p774_p2, %p773_p1 }
   0x7   :  { %p776_p4 = pnand %p775_p3, %p769_p0 }
   0x9   :  { %779 = shalt.err (!%p776_p4)
}
   0xa   :  { %s783_s15 = smov 128   ;;  %s784_s16 = smov 8  }
   0xb   :  { %22 = dma.hbm_to_vmem [thread:$0]  %s931_s1, 10240, %s17_s13, [#allocation3], %s783_s15, %s783_s15, %s784_s16  }
   0xc   :  { %780 = dma.done.wait [#allocation3], 10240  }
   0xd   :  { %781 = vsyncadd [#allocation3], 4294957056  ;;  %v785_v0 = vmov 0.0   ;;  %vm786_vm0 = vmmov 0   ;;  %v45_v1 = vld [vmem:[#allocation2 + $0x78] sm:$0xff]  ;;  %v44_v2 = vld [vmem:[#allocation2 + $0x70] sm:$0xff]  ;;  %v46_v47 = vlaneseq }
   0xe   :  { %580 = vmatprep.subr.mxu0 %v785_v0  ;;  %612 = vmatprep.mubr.msk.f32.mxu0 %vm786_vm0, %v785_v0  ;;  %v43_v3 = vld [vmem:[#allocation2 + $0x68] sm:$0xff]  ;;  %v42_v4 = vld [vmem:[#allocation2 + $0x60] sm:$0xff]  ;;  %v137_v5 = vld [vmem:[#allocation2 + $0xf8] sm:$0xff] }
   0xf   :  { %615 = vmatprep.subr.mxu1 %v785_v0  ;;  %647 = vmatprep.mubr.msk.f32.mxu1 %vm786_vm0, %v785_v0  ;;  %v41_v6 = vld [vmem:[#allocation2 + $0x58] sm:$0xff]  ;;  %v136_v7 = vld [vmem:[#allocation2 + $0xf0] sm:$0xff]  ;;  %v135_v8 = vld [vmem:[#allocation2 + $0xe8] sm:$0xff]  ;;  %v866_v48 = vshrl.u32 %v46_v47, 7 }
  0x10   :  { %581 = vmatpush3.msra.mxu0 %v45_v1  ;;  %616 = vmatpush3.msra.mxu1 %v137_v5  ;;  %v40_v9 = vld [vmem:[#allocation2 + $0x50] sm:$0xff]  ;;  %v134_v10 = vld [vmem:[#allocation2 + $0xe0] sm:$0xff]  ;;  %v39_v11 = vld [vmem:[#allocation2 + $0x48] sm:$0xff] }
  0x11   :  { %582 = vmatprep.subr.mxu0 %v785_v0  ;;  %617 = vmatprep.subr.mxu1 %v785_v0  ;;  %v133_v12 = vld [vmem:[#allocation2 + $0xd8] sm:$0xff]  ;;  %v38_v13 = vld [vmem:[#allocation2 + $0x40] sm:$0xff]  ;;  %v132_v14 = vld [vmem:[#allocation2 + $0xd0] sm:$0xff]  ;;  %v48_v49 = vsub.s32 0, %v866_v48  ;;  %v417_v47 = vsub.s32 4, %v866_v48 }
  0x12   :  { %583 = vmatpush3.msra.mxu0 %v44_v2  ;;  %618 = vmatpush3.msra.mxu1 %v136_v7  ;;  %v37_v15 = vld [vmem:[#allocation2 + $0x38] sm:$0xff]  ;;  %v131_v16 = vld [vmem:[#allocation2 + $0xc8] sm:$0xff]  ;;  %v36_v17 = vld [vmem:[#allocation2 + $0x30] sm:$0xff] }
  0x13   :  { %584 = vmatprep.subr.mxu0 %v785_v0  ;;  %619 = vmatprep.subr.mxu1 %v785_v0  ;;  %v130_v18 = vld [vmem:[#allocation2 + $0xc0] sm:$0xff]  ;;  %v35_v19 = vld [vmem:[#allocation2 + $0x28] sm:$0xff]  ;;  %v129_v20 = vld [vmem:[#allocation2 + $0xb8] sm:$0xff] }
  0x14   :  { %585 = vmatpush3.msra.mxu0 %v43_v3  ;;  %620 = vmatpush3.msra.mxu1 %v135_v8  ;;  %v34_v21 = vld [vmem:[#allocation2 + $0x20] sm:$0xff]  ;;  %v128_v22 = vld [vmem:[#allocation2 + $0xb0] sm:$0xff]  ;;  %v33_v23 = vld [vmem:[#allocation2 + $0x18] sm:$0xff]  ;;  %v140_v8 = vsub.s32 1, %v866_v48 }
  0x15   :  { %586 = vmatprep.subr.mxu0 %v785_v0  ;;  %621 = vmatprep.subr.mxu1 %v785_v0  ;;  %v127_v24 = vld [vmem:[#allocation2 + $0xa8] sm:$0xff]  ;;  %v32_v25 = vld [vmem:[#allocation2 + $0x10] sm:$0xff]  ;;  %v126_v26 = vld [vmem:[#allocation2 + $0xa0] sm:$0xff] }
  0x16   :  { %587 = vmatpush3.msra.mxu0 %v42_v4  ;;  %622 = vmatpush3.msra.mxu1 %v134_v10  ;;  %v31_v27 = vld [vmem:[#allocation2 + $0x8] sm:$0xff]  ;;  %v125_v28 = vld [vmem:[#allocation2 + $0x98] sm:$0xff]  ;;  %v30_v29 = vld [vmem:[#allocation2] sm:$0xff] }
  0x17   :  { %588 = vmatprep.subr.mxu0 %v785_v0  ;;  %623 = vmatprep.subr.mxu1 %v785_v0  ;;  %v28_v30 = vld [vmem:[%s930_s0] sm:$0xff]  ;;  %v124_v31 = vld [vmem:[#allocation2 + $0x90] sm:$0xff]  ;;  %v123_v32 = vld [vmem:[#allocation2 + $0x88] sm:$0xff] }
  0x18   :  { %589 = vmatpush3.msra.mxu0 %v41_v6  ;;  %624 = vmatpush3.msra.mxu1 %v133_v12  ;;  %v122_v33 = vld [vmem:[#allocation2 + $0x80] sm:$0xff]  ;;  %v229_v34 = vld [vmem:[#allocation2 + $0x178] sm:$0xff]  ;;  %v228_v35 = vld [vmem:[#allocation2 + $0x170] sm:$0xff] }
  0x19   :  { %590 = vmatprep.subr.mxu0 %v785_v0  ;;  %625 = vmatprep.subr.mxu1 %v785_v0  ;;  %v227_v36 = vld [vmem:[#allocation2 + $0x168] sm:$0xff]  ;;  %v226_v37 = vld [vmem:[#allocation2 + $0x160] sm:$0xff]  ;;  %v225_v38 = vld [vmem:[#allocation2 + $0x158] sm:$0xff] }
  0x1a   :  { %591 = vmatpush3.msra.mxu0 %v40_v9  ;;  %626 = vmatpush3.msra.mxu1 %v132_v14  ;;  %v224_v39 = vld [vmem:[#allocation2 + $0x150] sm:$0xff]  ;;  %v223_v40 = vld [vmem:[#allocation2 + $0x148] sm:$0xff]  ;;  %v222_v41 = vld [vmem:[#allocation2 + $0x140] sm:$0xff] }
  0x1b   :  { %592 = vmatprep.subr.mxu0 %v785_v0  ;;  %627 = vmatprep.subr.mxu1 %v785_v0  ;;  %v221_v42 = vld [vmem:[#allocation2 + $0x138] sm:$0xff]  ;;  %v220_v43 = vld [vmem:[#allocation2 + $0x130] sm:$0xff]  ;;  %v219_v44 = vld [vmem:[#allocation2 + $0x128] sm:$0xff] }
  0x1c   :  { %593 = vmatpush3.msra.mxu0 %v39_v11  ;;  %628 = vmatpush3.msra.mxu1 %v131_v16  ;;  %v218_v45 = vld [vmem:[#allocation2 + $0x120] sm:$0xff]  ;;  %v217_v46 = vld [vmem:[#allocation2 + $0x118] sm:$0xff]  ;;  %v216_v56 = vld [vmem:[#allocation2 + $0x110] sm:$0xff] }
  0x1d   :  { %594 = vmatprep.subr.mxu0 %v785_v0  ;;  %629 = vmatprep.subr.mxu1 %v785_v0  ;;  %v872_v50 = vld [vmem:[%s932_s2] sm:$0xff]  ;;  %v215_v57 = vld [vmem:[#allocation2 + $0x108] sm:$0xff]  ;;  %v322_v59 = vld [vmem:[#allocation2 + $0x1f8] sm:$0xff] }
  0x1e   :  { %595 = vmatpush3.msra.mxu0 %v38_v13  ;;  %630 = vmatpush3.msra.mxu1 %v130_v18  ;;  %v49_v51 = vrot.slane %v872_v50, %v48_v49  ;;  %v214_v58 = vld [vmem:[#allocation2 + $0x100] sm:$0xff]  ;;  %v321_v60 = vld [vmem:[#allocation2 + $0x1f0] sm:$0xff]  ;;  %v320_v61 = vld [vmem:[#allocation2 + $0x1e8] sm:$0xff]  ;;  %v141_v9 = vrot.slane %v872_v50, %v140_v8  ;;  %v418_v49 = vrot.slane %v872_v50, %v417_v47 }
  0x1f   :  { %596 = vmatprep.subr.mxu0 %v785_v0  ;;  %631 = vmatprep.subr.mxu1 %v785_v0  ;;  %v319_v62 = vld [vmem:[#allocation2 + $0x1e0] sm:$0xff]  ;;  %v318_v63 = vld [vmem:[#allocation2 + $0x1d8] sm:$0xff]  ;;  %v317_v1 = vld [vmem:[#allocation2 + $0x1d0] sm:$0xff] }
  0x20   :  { %597 = vmatpush3.msra.mxu0 %v37_v15  ;;  %632 = vmatpush3.msra.mxu1 %v129_v20  ;;  %v316_v2 = vld [vmem:[#allocation2 + $0x1c8] sm:$0xff]  ;;  %v315_v3 = vld [vmem:[#allocation2 + $0x1c0] sm:$0xff]  ;;  %v314_v4 = vld [vmem:[#allocation2 + $0x1b8] sm:$0xff] }
  0x21   :  { %598 = vmatprep.subr.mxu0 %v785_v0  ;;  %633 = vmatprep.subr.mxu1 %v785_v0  ;;  %v313_v5 = vld [vmem:[#allocation2 + $0x1b0] sm:$0xff]  ;;  %v312_v6 = vld [vmem:[#allocation2 + $0x1a8] sm:$0xff]  ;;  %v311_v7 = vld [vmem:[#allocation2 + $0x1a0] sm:$0xff] }
  0x22   :  { %599 = vmatpush3.msra.mxu0 %v36_v17  ;;  %634 = vmatpush3.msra.mxu1 %v128_v22  ;;  %v310_v14 = vld [vmem:[#allocation2 + $0x198] sm:$0xff]  ;;  %v309_v15 = vld [vmem:[#allocation2 + $0x190] sm:$0xff]  ;;  %v308_v16 = vld [vmem:[#allocation2 + $0x188] sm:$0xff] }
  0x23   :  { %600 = vmatprep.subr.mxu0 %v785_v0  ;;  %635 = vmatprep.subr.mxu1 %v785_v0  ;;  %v307_v17 = vld [vmem:[#allocation2 + $0x180] sm:$0xff]  ;;  %v414_v18 = vld [vmem:[#allocation2 + $0x278] sm:$0xff]  ;;  %v412_v20 = vld [vmem:[#allocation2 + $0x268] sm:$0xff] }
  0x24   :  { %601 = vmatpush3.msra.mxu0 %v35_v19  ;;  %636 = vmatpush3.msra.mxu1 %v127_v24  ;;  %v413_v19 = vld [vmem:[#allocation2 + $0x270] sm:$0xff]  ;;  %v410_v22 = vld [vmem:[#allocation2 + $0x258] sm:$0xff]  ;;  %v408_v24 = vld [vmem:[#allocation2 + $0x248] sm:$0xff] }
  0x25   :  { %602 = vmatprep.subr.mxu0 %v785_v0  ;;  %637 = vmatprep.subr.mxu1 %v785_v0 }
  0x26   :  { %603 = vmatpush3.msra.mxu0 %v34_v21  ;;  %638 = vmatpush3.msra.mxu1 %v126_v26  ;;  %v411_v21 = vld [vmem:[#allocation2 + $0x260] sm:$0xff]  ;;  %v406_v26 = vld [vmem:[#allocation2 + $0x238] sm:$0xff] }
  0x27   :  { %604 = vmatprep.subr.mxu0 %v785_v0  ;;  %639 = vmatprep.subr.mxu1 %v785_v0 }
  0x28   :  { %605 = vmatpush3.msra.mxu0 %v33_v23  ;;  %640 = vmatpush3.msra.mxu1 %v125_v28  ;;  %v409_v23 = vld [vmem:[#allocation2 + $0x250] sm:$0xff]  ;;  %v404_v28 = vld [vmem:[#allocation2 + $0x228] sm:$0xff] }
  0x29   :  { %606 = vmatprep.subr.mxu0 %v785_v0  ;;  %641 = vmatprep.subr.mxu1 %v785_v0 }
  0x2a   :  { %607 = vmatpush3.msra.mxu0 %v32_v25  ;;  %642 = vmatpush3.msra.mxu1 %v124_v31  ;;  %v407_v25 = vld [vmem:[#allocation2 + $0x240] sm:$0xff]  ;;  %v232_v31 = vsub.s32 2, %v866_v48 }
  0x2b   :  { %608 = vmatprep.subr.mxu0 %v785_v0  ;;  %643 = vmatprep.subr.mxu1 %v785_v0 }
  0x2c   :  { %609 = vmatpush3.msra.mxu0 %v31_v27  ;;  %644 = vmatpush3.msra.mxu1 %v123_v32  ;;  %v405_v27 = vld [vmem:[#allocation2 + $0x230] sm:$0xff]  ;;  %v233_v32 = vrot.slane %v872_v50, %v232_v31 }
  0x2d   :  { %610 = vmatprep.subr.mxu0 %v785_v0  ;;  %645 = vmatprep.subr.mxu1 %v785_v0 }
  0x2e   :  { %611 = vmatpush3.msra.mxu0 %v30_v29  ;;  %646 = vmatpush3.msra.mxu1 %v122_v33  ;;  %v403_v29 = vld [vmem:[#allocation2 + $0x220] sm:$0xff] }
  0x2f   :  { %613 = vmatmul.mubr.f32.vlgmr.msra.gmra.mxu0 %v28_v30  ;;  %650 = vmatprep.subr.mxu0 %v785_v0  ;;  %v402_v30 = vld [vmem:[#allocation2 + $0x218] sm:$0xff] }
  0x30   :  { %682 = vmatprep.mubr.msk.f32.mxu0 %vm786_vm0, %v785_v0  ;;  %685 = vmatprep.subr.mxu1 %v785_v0 }
  0x31   :  { %651 = vmatpush3.msra.mxu0 %v229_v34 }
  0x32   :  { %652 = vmatprep.subr.mxu0 %v785_v0 }
  0x33   :  { %653 = vmatpush3.msra.mxu0 %v228_v35 }
  0x34   :  { %654 = vmatprep.subr.mxu0 %v785_v0 }
  0x35   :  { %655 = vmatpush3.msra.mxu0 %v227_v36 }
  0x36   :  { %656 = vmatprep.subr.mxu0 %v785_v0 }
  0x37   :  { %657 = vmatpush3.msra.mxu0 %v226_v37 }
  0x38   :  { %658 = vmatprep.subr.mxu0 %v785_v0 }
  0x39   :  { %659 = vmatpush3.msra.mxu0 %v225_v38  ;;  %v401_v38 = vld [vmem:[#allocation2 + $0x210] sm:$0xff] }
  0x3a   :  { %660 = vmatprep.subr.mxu0 %v785_v0 }
  0x3b   :  { %661 = vmatpush3.msra.mxu0 %v224_v39  ;;  %v400_v39 = vld [vmem:[#allocation2 + $0x208] sm:$0xff] }
  0x3c   :  { %662 = vmatprep.subr.mxu0 %v785_v0 }
  0x3d   :  { %663 = vmatpush3.msra.mxu0 %v223_v40  ;;  %v399_v40 = vld [vmem:[#allocation2 + $0x200] sm:$0xff] }
  0x3e   :  { %664 = vmatprep.subr.mxu0 %v785_v0 }
  0x3f   :  { %665 = vmatpush3.msra.mxu0 %v222_v41  ;;  %v325_v41 = vsub.s32 3, %v866_v48 }
  0x40   :  { %666 = vmatprep.subr.mxu0 %v785_v0 }
  0x41   :  { %667 = vmatpush3.msra.mxu0 %v221_v42  ;;  %v326_v42 = vrot.slane %v872_v50, %v325_v41 }
  0x42   :  { %668 = vmatprep.subr.mxu0 %v785_v0 }
  0x43   :  { %669 = vmatpush3.msra.mxu0 %v220_v43 }
  0x44   :  { %670 = vmatprep.subr.mxu0 %v785_v0 }
  0x45   :  { %671 = vmatpush3.msra.mxu0 %v219_v44 }
  0x46   :  { %672 = vmatprep.subr.mxu0 %v785_v0 }
  0x47   :  { %673 = vmatpush3.msra.mxu0 %v218_v45 }
  0x48   :  { %674 = vmatprep.subr.mxu0 %v785_v0 }
  0x49   :  { %675 = vmatpush3.msra.mxu0 %v217_v46 }
  0x4a   :  { %676 = vmatprep.subr.mxu0 %v785_v0 }
  0x4b   :  { %677 = vmatpush3.msra.mxu0 %v216_v56 }
  0x4c   :  { %678 = vmatprep.subr.mxu0 %v785_v0 }
  0x4d   :  { %679 = vmatpush3.msra.mxu0 %v215_v57 }
  0x4e   :  { %680 = vmatprep.subr.mxu0 %v785_v0 }
  0x4f   :  { %681 = vmatpush3.msra.mxu0 %v214_v58 }
  0x50   :  { %720 = vmatprep.subr.mxu0 %v785_v0 }
  0xef   :  { %v116_v52 = vpop.f32.mrf.mxu0 }
  0xf0   :  { %v875_v53 = vadd.f32 %v116_v52, %v49_v51 }
  0xf1   :  { %v614_v54 = vpop.f32.mrf.mxu0 }
  0xf2   :  { %v120_v55 = vmax.f32 %v875_v53, 0.0 }
  0xf4   :  { %648 = vmatmul.mubr.f32.vlgmr.msra.gmra.mxu1 %v120_v55 }
  0xf5   :  { %717 = vmatprep.mubr.msk.f32.mxu1 %vm786_vm0, %v785_v0  ;;  %686 = vmatpush3.msra.mxu1 %v322_v59 }
  0xf6   :  { %687 = vmatprep.subr.mxu1 %v785_v0 }
  0xf7   :  { %688 = vmatpush3.msra.mxu1 %v321_v60 }
  0xf8   :  { %689 = vmatprep.subr.mxu1 %v785_v0 }
  0xf9   :  { %690 = vmatpush3.msra.mxu1 %v320_v61 }
  0xfa   :  { %691 = vmatprep.subr.mxu1 %v785_v0 }
  0xfb   :  { %692 = vmatpush3.msra.mxu1 %v319_v62 }
  0xfc   :  { %693 = vmatprep.subr.mxu1 %v785_v0 }
  0xfd   :  { %694 = vmatpush3.msra.mxu1 %v318_v63 }
  0xfe   :  { %695 = vmatprep.subr.mxu1 %v785_v0 }
  0xff   :  { %696 = vmatpush3.msra.mxu1 %v317_v1 }
 0x100   :  { %697 = vmatprep.subr.mxu1 %v785_v0 }
 0x101   :  { %698 = vmatpush3.msra.mxu1 %v316_v2 }
 0x102   :  { %699 = vmatprep.subr.mxu1 %v785_v0 }
 0x103   :  { %700 = vmatpush3.msra.mxu1 %v315_v3 }
 0x104   :  { %701 = vmatprep.subr.mxu1 %v785_v0 }
 0x105   :  { %702 = vmatpush3.msra.mxu1 %v314_v4 }
 0x106   :  { %703 = vmatprep.subr.mxu1 %v785_v0 }
 0x107   :  { %704 = vmatpush3.msra.mxu1 %v313_v5 }
 0x108   :  { %705 = vmatprep.subr.mxu1 %v785_v0 }
 0x109   :  { %706 = vmatpush3.msra.mxu1 %v312_v6 }
 0x10a   :  { %707 = vmatprep.subr.mxu1 %v785_v0 }
 0x10b   :  { %708 = vmatpush3.msra.mxu1 %v311_v7 }
 0x10c   :  { %709 = vmatprep.subr.mxu1 %v785_v0 }
 0x10d   :  { %710 = vmatpush3.msra.mxu1 %v310_v14 }
 0x10e   :  { %711 = vmatprep.subr.mxu1 %v785_v0 }
 0x10f   :  { %712 = vmatpush3.msra.mxu1 %v309_v15 }
 0x110   :  { %713 = vmatprep.subr.mxu1 %v785_v0 }
 0x111   :  { %714 = vmatpush3.msra.mxu1 %v308_v16 }
 0x112   :  { %715 = vmatprep.subr.mxu1 %v785_v0 }
 0x113   :  { %716 = vmatpush3.msra.mxu1 %v307_v17 }
 0x1b4   :  { %v208_v10 = vpop.f32.mrf.mxu1 }
 0x1b5   :  { %v209_v11 = vadd.f32 %v208_v10, %v141_v9 }
 0x1b6   :  { %v649_v12 = vpop.f32.mrf.mxu1 }
 0x1b7   :  { %v212_v13 = vmax.f32 %v209_v11, 0.0 }
 0x1b9   :  { %683 = vmatmul.mubr.f32.vlgmr.msra.gmra.mxu0 %v212_v13 }
 0x1ba   :  { %752 = vmatprep.mubr.msk.f32.mxu0 %vm786_vm0, %v785_v0  ;;  %721 = vmatpush3.msra.mxu0 %v414_v18 }
 0x1bb   :  { %722 = vmatprep.subr.mxu0 %v785_v0 }
 0x1bc   :  { %723 = vmatpush3.msra.mxu0 %v413_v19 }
 0x1bd   :  { %724 = vmatprep.subr.mxu0 %v785_v0 }
 0x1be   :  { %725 = vmatpush3.msra.mxu0 %v412_v20 }
 0x1bf   :  { %726 = vmatprep.subr.mxu0 %v785_v0 }
 0x1c0   :  { %727 = vmatpush3.msra.mxu0 %v411_v21 }
 0x1c1   :  { %728 = vmatprep.subr.mxu0 %v785_v0 }
 0x1c2   :  { %729 = vmatpush3.msra.mxu0 %v410_v22 }
 0x1c3   :  { %730 = vmatprep.subr.mxu0 %v785_v0 }
 0x1c4   :  { %731 = vmatpush3.msra.mxu0 %v409_v23 }
 0x1c5   :  { %732 = vmatprep.subr.mxu0 %v785_v0 }
 0x1c6   :  { %733 = vmatpush3.msra.mxu0 %v408_v24 }
 0x1c7   :  { %734 = vmatprep.subr.mxu0 %v785_v0 }
 0x1c8   :  { %735 = vmatpush3.msra.mxu0 %v407_v25 }
 0x1c9   :  { %736 = vmatprep.subr.mxu0 %v785_v0 }
 0x1ca   :  { %737 = vmatpush3.msra.mxu0 %v406_v26 }
 0x1cb   :  { %738 = vmatprep.subr.mxu0 %v785_v0 }
 0x1cc   :  { %739 = vmatpush3.msra.mxu0 %v405_v27 }
 0x1cd   :  { %740 = vmatprep.subr.mxu0 %v785_v0 }
 0x1ce   :  { %741 = vmatpush3.msra.mxu0 %v404_v28 }
 0x1cf   :  { %742 = vmatprep.subr.mxu0 %v785_v0 }
 0x1d0   :  { %743 = vmatpush3.msra.mxu0 %v403_v29 }
 0x1d1   :  { %744 = vmatprep.subr.mxu0 %v785_v0 }
 0x1d2   :  { %745 = vmatpush3.msra.mxu0 %v402_v30 }
 0x1d3   :  { %746 = vmatprep.subr.mxu0 %v785_v0 }
 0x1d4   :  { %747 = vmatpush3.msra.mxu0 %v401_v38 }
 0x1d5   :  { %748 = vmatprep.subr.mxu0 %v785_v0 }
 0x1d6   :  { %749 = vmatpush3.msra.mxu0 %v400_v39 }
 0x1d7   :  { %750 = vmatprep.subr.mxu0 %v785_v0 }
 0x1d8   :  { %751 = vmatpush3.msra.mxu0 %v399_v40 }
 0x279   :  { %v300_v33 = vpop.f32.mrf.mxu0 }
 0x27a   :  { %v301_v34 = vadd.f32 %v300_v33, %v233_v32 }
 0x27b   :  { %v684_v35 = vpop.f32.mrf.mxu0 }
 0x27c   :  { %v304_v36 = vadd.f32 %v301_v34, %v120_v55 }
 0x27e   :  { %v305_v37 = vmax.f32 %v304_v36, 0.0 }
 0x280   :  { %718 = vmatmul.mubr.f32.vlgmr.msra.gmra.mxu1 %v305_v37 }
 0x340   :  { %v393_v43 = vpop.f32.mrf.mxu1 }
 0x341   :  { %v394_v44 = vadd.f32 %v393_v43, %v326_v42 }
 0x342   :  { %v719_v45 = vpop.f32.mrf.mxu1 }
 0x343   :  { %v397_v46 = vmax.f32 %v394_v44, 0.0 }
 0x345   :  { %753 = vmatmul.mubr.f32.vlgmr.msra.gmra.mxu0 %v397_v46 }
 0x405   :  { %v485_v51 = vpop.f32.mrf.mxu0 }
 0x406   :  { %v486_v52 = vadd.f32 %v485_v51, %v418_v49 }
 0x407   :  { %v754_v53 = vpop.f32.mrf.mxu0 }
 0x408   :  { %489 = vst [vmem:[%s933_s3] sm:$0xff] %v486_v52 }
 0x409   :  { %494 = vsyncpa [#allocation3], 1 }

</bundles_post_ra>
